<compile_context>
chip_gen: v5e
topology: v5e:2x2
jax: 0.10.0
libtpu: 0.0.40
codegen_flags: <defaults>
</compile_context>

<pallas_src>
import numpy as np
import jax
import jax.numpy as jnp
from jax import lax
from jax.experimental import pallas as pl
from jax.experimental.pallas import tpu as pltpu

# ---------------- model hyper-params (small, consistent with the module) ----
B = 2            # batch
N = 8            # sequence length
EMB = 32         # emb_size
NUM_HEADS = 4
HEAD_DIM = EMB // NUM_HEADS
EXPANSION = 4
HIDDEN = EXPANSION * EMB
LN_EPS = 1e-5

BN = B * N                     # 16 tokens total
R = NUM_HEADS * BN             # 64 rows: one per (head, batch*token)

# ---- packed vector-slab layout: one (16, 128) f32 operand ------------------
VEC_ROWS, VEC_W = 16, 128
ROW_BQ, ROW_BK, ROW_BV, ROW_BOUT = 0, 1, 2, 3
ROW_G1, ROW_BE1 = 4, 5
ROW_B1 = 6
ROW_B2 = 7
ROW_G2, ROW_BE2 = 8, 9

# ---- stacked projection-weight planes ---------------------------------------
W_Q, W_K, W_V, W_OUT = 0, 1, 2, 3

# ---- constant-mask planes (built once with numpy at trace time) -------------
M_QSCALE, M_CTX, M_BIAS = 0, 1, 2


def _build_masks():
    """Head-select masks and same-batch score bias as compile-time constants.

    Row r = h*BN + (b*N + n) of the head-replicated Q. Plane 0 keeps only head
    h's feature columns (scaled by 1/sqrt(head_dim)); plane 1 is the 0/1 version
    used on the context; plane 2 holds the -1e30 cross-batch additive bias in
    its first BN columns.
    """
    scale = 1.0 / (HEAD_DIM ** 0.5)
    rows = np.arange(R)[:, None]
    cols_e = np.arange(EMB)[None, :]
    head01 = (rows // BN == cols_e // HEAD_DIM).astype(np.float32)     # (R, EMB)
    q_mask = head01 * scale
    cols_t = np.arange(BN)[None, :]
    same_batch = ((rows % BN) // N) == (cols_t // N)                   # (R, BN)
    bias = np.where(same_batch, 0.0, -1e30).astype(np.float32)
    bias_pad = np.zeros((R, EMB), np.float32)
    bias_pad[:, :BN] = bias
    return np.stack([q_mask, head01, bias_pad], axis=0)                # (3, R, EMB)


_MASKS = _build_masks()


def _transformer_block_kernel(
    x_ref,       # (BN, EMB)
    w_ref,       # (4, EMB, EMB)  [Wq, Wk, Wv, Wout]
    w1_ref,      # (EMB, HIDDEN)
    w2_ref,      # (HIDDEN, EMB)
    vec_ref,     # (VEC_ROWS, VEC_W) packed biases / LN params
    m_ref,       # (3, R, EMB) constant masks
    o_ref,       # (BN, EMB)
):
    x = x_ref[...]                                  # (16, 32) f32
    slab = vec_ref[...]                             # (16, 128), read once

    def vec(row, width=EMB):
        return slab[row:row + 1, 0:width]           # (1, width) static slice

    # ---- QKV projections ----------------------------------------------------
    q = jnp.dot(x, w_ref[W_Q], preferred_element_type=jnp.float32) + vec(ROW_BQ)
    k = jnp.dot(x, w_ref[W_K], preferred_element_type=jnp.float32) + vec(ROW_BK)
    v = jnp.dot(x, w_ref[W_V], preferred_element_type=jnp.float32) + vec(ROW_BV)

    # ---- multi-head self attention: all heads & batches in 2 MXU matmuls ----
    q_mask = m_ref[M_QSCALE]                        # (64, 32), scale folded in
    ctx_mask = m_ref[M_CTX]                         # (64, 32), 0/1
    score_bias = m_ref[M_BIAS][:, 0:BN]             # (64, 16)

    q_rep = jnp.concatenate([q] * NUM_HEADS, axis=0) * q_mask          # (64, 32)
    s = jnp.einsum("re,te->rt", q_rep, k,
                   preferred_element_type=jnp.float32)                 # (64, 16)
    s = s + score_bias
    s = s - jnp.max(s, axis=-1, keepdims=True)
    p = jnp.exp(s)
    p = p / jnp.sum(p, axis=-1, keepdims=True)      # exact divide (torch parity)
    # TODO(synk): attention dropout skipped (eval-mode identity)

    ctx = jnp.dot(p, v, preferred_element_type=jnp.float32) * ctx_mask  # (64, 32)
    # Sum the NUM_HEADS tile-aligned row blocks -> concatenated-heads output.
    attn = ctx[0:BN]
    for h in range(1, NUM_HEADS):
        attn = attn + ctx[h * BN:(h + 1) * BN]                          # (16, 32)

    attn = jnp.dot(attn, w_ref[W_OUT],
                   preferred_element_type=jnp.float32) + vec(ROW_BOUT)

    # ---- residual + layernorm 1 ---------------------------------------------
    h1 = attn + x
    mu1 = jnp.mean(h1, axis=-1, keepdims=True)
    var1 = jnp.mean(jnp.square(h1 - mu1), axis=-1, keepdims=True)
    x1 = (h1 - mu1) * lax.rsqrt(var1 + LN_EPS)
    x1 = x1 * vec(ROW_G1) + vec(ROW_BE1)                                # (16, 32)

    # ---- feed forward: Linear -> GELU(exact) -> Linear ----------------------
    f = jnp.dot(x1, w1_ref[...],
                preferred_element_type=jnp.float32) + vec(ROW_B1, HIDDEN)
    f = 0.5 * f * (1.0 + lax.erf(f * 0.7071067811865476))               # exact GELU
    f = jnp.dot(f, w2_ref[...],
                preferred_element_type=jnp.float32) + vec(ROW_B2)
    # TODO(synk): FFN dropout skipped (eval-mode identity)

    # ---- residual + layernorm 2 ---------------------------------------------
    h2 = f + x1
    mu2 = jnp.mean(h2, axis=-1, keepdims=True)
    var2 = jnp.mean(jnp.square(h2 - mu2), axis=-1, keepdims=True)
    out = (h2 - mu2) * lax.rsqrt(var2 + LN_EPS)
    out = out * vec(ROW_G2) + vec(ROW_BE2)

    o_ref[...] = out.astype(o_ref.dtype)


def transformer_block(x, params):
    """x: (B, N, EMB) float32.  params: dict of pre-transposed weights/biases."""
    b, n, e = x.shape
    assert (b, n, e) == (B, N, EMB)

    # Flatten batch*sequence outside the kernel (free, pure layout).
    x2 = x.reshape(BN, EMB)

    # One stacked (4, E, E) weight operand: leading-axis indexing in-kernel is free.
    wqkv, bqkv = params["wqkv"], params["bqkv"]
    w_stack = jnp.stack(
        [wqkv[:, :EMB], wqkv[:, EMB:2 * EMB], wqkv[:, 2 * EMB:], params["wout"]],
        axis=0)                                                     # (4, EMB, EMB)

    # One (16, 128) slab holding every bias / gamma / beta (rows zero-padded).
    def row(vecarr):
        flat = vecarr.reshape(-1)
        return jnp.pad(flat, (0, VEC_W - flat.shape[0]))
    rows = [
        row(bqkv[:, :EMB]), row(bqkv[:, EMB:2 * EMB]), row(bqkv[:, 2 * EMB:]),
        row(params["bout"]),
        row(params["g1"]), row(params["be1"]),
        row(params["b1"]),
        row(params["b2"]),
        row(params["g2"]), row(params["be2"]),
    ]
    rows += [jnp.zeros((VEC_W,), jnp.float32)] * (VEC_ROWS - len(rows))
    vec_slab = jnp.stack(rows, axis=0)                              # (16, 128)

    masks = jnp.asarray(_MASKS)                                     # (3, 64, 32)

    inputs = (x2, w_stack, params["w1"], params["w2"], vec_slab, masks)

    in_specs = [
        pl.BlockSpec((BN, EMB), lambda i: (0, 0)),
        pl.BlockSpec((4, EMB, EMB), lambda i: (0, 0, 0)),
        pl.BlockSpec((EMB, HIDDEN), lambda i: (0, 0)),
        pl.BlockSpec((HIDDEN, EMB), lambda i: (0, 0)),
        pl.BlockSpec((VEC_ROWS, VEC_W), lambda i: (0, 0)),
        pl.BlockSpec((3, R, EMB), lambda i: (0, 0, 0)),
    ]
    out_spec = pl.BlockSpec((BN, EMB), lambda i: (0, 0))

    cost = pl.CostEstimate(flops=600_000, transcendentals=3_500,
                           bytes_accessed=90_000)

    fn = pl.pallas_call(
        _transformer_block_kernel,
        out_shape=jax.ShapeDtypeStruct((BN, EMB), x.dtype),
        grid_spec=pltpu.PrefetchScalarGridSpec(
            num_scalar_prefetch=0,
            grid=(1,),                       # single grid step: no per-step overhead
            in_specs=in_specs,
            out_specs=out_spec,
        ),
        compiler_params=pltpu.CompilerParams(
            dimension_semantics=("arbitrary",)),
        cost_estimate=cost,
    )
    out2 = fn(*inputs)
    return out2.reshape(B, N, EMB)


def init_params(key):
    """Deterministic synthetic parameters matching the torch module's shapes,
    stored pre-transposed (in_features, out_features) for x @ W + b."""
    ks = jax.random.split(key, 8)
    std = 0.02
    return {
        # qkv: torch Linear(EMB, 3*EMB) -> weight (3E, E); stored transposed (E, 3E)
        "wqkv": jax.random.normal(ks[0], (EMB, 3 * EMB), jnp.float32) * std,
        "bqkv": jax.random.normal(ks[1], (1, 3 * EMB), jnp.float32) * std,
        # fc_out: Linear(EMB, EMB)
        "wout": jax.random.normal(ks[2], (EMB, EMB), jnp.float32) * std,
        "bout": jax.random.normal(ks[3], (1, EMB), jnp.float32) * std,
        # layernorm1
        "g1": jnp.ones((1, EMB), jnp.float32),
        "be1": jnp.zeros((1, EMB), jnp.float32),
        # feed_forward: Linear(EMB, HIDDEN), Linear(HIDDEN, EMB)
        "w1": jax.random.normal(ks[4], (EMB, HIDDEN), jnp.float32) * std,
        "b1": jax.random.normal(ks[5], (1, HIDDEN), jnp.float32) * std,
        "w2": jax.random.normal(ks[6], (HIDDEN, EMB), jnp.float32) * std,
        "b2": jax.random.normal(ks[7], (1, EMB), jnp.float32) * std,
        # layernorm2
        "g2": jnp.ones((1, EMB), jnp.float32),
        "be2": jnp.zeros((1, EMB), jnp.float32),
    }


def _reference(x, params):
    """Pure-JAX re-derivation of the torch TransformerBlock (eval mode)."""
    x2 = x.reshape(BN, EMB)
    hi = jax.lax.Precision.HIGHEST
    qkv = jnp.dot(x2, params["wqkv"], precision=hi) + params["bqkv"]
    qkv = qkv.reshape(B, N, 3, NUM_HEADS, HEAD_DIM)
    q, k, v = jnp.transpose(qkv, (2, 0, 3, 1, 4))                      # (B,H,N,hd)
    scores = jnp.einsum("bhnd,bhmd->bhnm", q, k, precision=hi) / (HEAD_DIM ** 0.5)
    attn = jax.nn.softmax(scores, axis=-1)
    ctx = jnp.einsum("bhnm,bhmd->bhnd", attn, v, precision=hi)
    ctx = jnp.transpose(ctx, (0, 2, 1, 3)).reshape(BN, EMB)
    ctx = jnp.dot(ctx, params["wout"], precision=hi) + params["bout"]

    def ln(h, g, be):
        mu = jnp.mean(h, axis=-1, keepdims=True)
        var = jnp.mean(jnp.square(h - mu), axis=-1, keepdims=True)
        return (h - mu) * lax.rsqrt(var + LN_EPS) * g + be

    x1 = ln(ctx + x2, params["g1"], params["be1"])
    f = jnp.dot(x1, params["w1"], precision=hi) + params["b1"]
    f = 0.5 * f * (1.0 + lax.erf(f * 0.7071067811865476))
    f = jnp.dot(f, params["w2"], precision=hi) + params["b2"]
    out = ln(f + x1, params["g2"], params["be2"])
    return out.reshape(B, N, EMB)


if __name__ == "__main__":
    key = jax.random.PRNGKey(0)
    kx, kp = jax.random.split(key)
    x = jax.random.normal(kx, (B, N, EMB), jnp.float32)
    params = init_params(kp)

    out = transformer_block(x, params)
    out = jax.block_until_ready(out)
    assert out.shape == (B, N, EMB) and out.dtype == jnp.float32

    ref = jax.block_until_ready(_reference(x, params))
    np.testing.assert_allclose(np.asarray(out), np.asarray(ref), rtol=2e-2, atol=2e-2)

    print("KERNEL_OK")
</pallas_src>

<mosaic_0001>
module attributes {stable_mosaic.version = 11 : i64} {
  func.func @_transformer_block_kernel(%arg0: i32, %arg1: memref<16x32xf32, #tpu.memory_space<vmem>>, %arg2: memref<4x32x32xf32, #tpu.memory_space<vmem>>, %arg3: memref<32x128xf32, #tpu.memory_space<vmem>>, %arg4: memref<128x32xf32, #tpu.memory_space<vmem>>, %arg5: memref<16x128xf32, #tpu.memory_space<vmem>>, %arg6: memref<3x64x32xf32, #tpu.memory_space<vmem>>, %arg7: memref<16x32xf32, #tpu.memory_space<vmem>>) attributes {dimension_semantics = [#tpu.dimension_semantics<arbitrary>], iteration_bounds = array<i64: 1>, scalar_prefetch = 0 : i64, scratch_operands = 0 : i64, tpu.core_type = #tpu.core_type<tc>, window_params = [{pipeline_mode = #tpu.pipeline_mode<synchronous>, transform_indices = @transform_0, window_bounds = array<i64: 16, 32>}, {pipeline_mode = #tpu.pipeline_mode<synchronous>, transform_indices = @transform_1, window_bounds = array<i64: 4, 32, 32>}, {pipeline_mode = #tpu.pipeline_mode<synchronous>, transform_indices = @transform_2, window_bounds = array<i64: 32, 128>}, {pipeline_mode = #tpu.pipeline_mode<synchronous>, transform_indices = @transform_3, window_bounds = array<i64: 128, 32>}, {pipeline_mode = #tpu.pipeline_mode<synchronous>, transform_indices = @transform_4, window_bounds = array<i64: 16, 128>}, {pipeline_mode = #tpu.pipeline_mode<synchronous>, transform_indices = @transform_5, window_bounds = array<i64: 3, 64, 32>}, {pipeline_mode = #tpu.pipeline_mode<synchronous>, transform_indices = @transform_6, window_bounds = array<i64: 16, 32>}]} {
    %c0 = arith.constant 0 : index
    %c0_0 = arith.constant 0 : index
    %0 = vector.load %arg1[%c0, %c0_0] : memref<16x32xf32, #tpu.memory_space<vmem>>, vector<16x32xf32>
    %c0_1 = arith.constant 0 : index
    %c0_2 = arith.constant 0 : index
    %1 = vector.load %arg5[%c0_1, %c0_2] : memref<16x128xf32, #tpu.memory_space<vmem>>, vector<16x128xf32>
    %c0_3 = arith.constant 0 : index
    %c0_4 = arith.constant 0 : index
    %c0_5 = arith.constant 0 : index
    %2 = vector.load %arg2[%c0_3, %c0_4, %c0_5] : memref<4x32x32xf32, #tpu.memory_space<vmem>>, vector<1x32x32xf32>
    %3 = vector.shape_cast %2 : vector<1x32x32xf32> to vector<32x32xf32>
    %cst = arith.constant dense<0.000000e+00> : vector<16x32xf32>
    %4 = tpu.matmul %0, %3, %cst {dimension_numbers = #tpu.dot_dimension_numbers<[1], [0], [0], [1], [0, 0, 1, 1], [], []>} : vector<16x32xf32>, vector<32x32xf32>, vector<16x32xf32> -> vector<16x32xf32>
    %5 = vector.extract_strided_slice %1 {offsets = [0, 0], sizes = [1, 32], strides = [1, 1]} : vector<16x128xf32> to vector<1x32xf32>
    %6 = vector.broadcast %5 : vector<1x32xf32> to vector<16x32xf32>
    %7 = arith.addf %4, %6 : vector<16x32xf32>
    %c1 = arith.constant 1 : index
    %c0_6 = arith.constant 0 : index
    %c0_7 = arith.constant 0 : index
    %8 = vector.load %arg2[%c1, %c0_6, %c0_7] : memref<4x32x32xf32, #tpu.memory_space<vmem>>, vector<1x32x32xf32>
    %9 = vector.shape_cast %8 : vector<1x32x32xf32> to vector<32x32xf32>
    %cst_8 = arith.constant dense<0.000000e+00> : vector<16x32xf32>
    %10 = tpu.matmul %0, %9, %cst_8 {dimension_numbers = #tpu.dot_dimension_numbers<[1], [0], [0], [1], [0, 0, 1, 1], [], []>} : vector<16x32xf32>, vector<32x32xf32>, vector<16x32xf32> -> vector<16x32xf32>
    %11 = vector.extract_strided_slice %1 {offsets = [1, 0], sizes = [1, 32], strides = [1, 1]} : vector<16x128xf32> to vector<1x32xf32>
    %12 = vector.broadcast %11 : vector<1x32xf32> to vector<16x32xf32>
    %13 = arith.addf %10, %12 : vector<16x32xf32>
    %c2 = arith.constant 2 : index
    %c0_9 = arith.constant 0 : index
    %c0_10 = arith.constant 0 : index
    %14 = vector.load %arg2[%c2, %c0_9, %c0_10] : memref<4x32x32xf32, #tpu.memory_space<vmem>>, vector<1x32x32xf32>
    %15 = vector.shape_cast %14 : vector<1x32x32xf32> to vector<32x32xf32>
    %cst_11 = arith.constant dense<0.000000e+00> : vector<16x32xf32>
    %16 = tpu.matmul %0, %15, %cst_11 {dimension_numbers = #tpu.dot_dimension_numbers<[1], [0], [0], [1], [0, 0, 1, 1], [], []>} : vector<16x32xf32>, vector<32x32xf32>, vector<16x32xf32> -> vector<16x32xf32>
    %17 = vector.extract_strided_slice %1 {offsets = [2, 0], sizes = [1, 32], strides = [1, 1]} : vector<16x128xf32> to vector<1x32xf32>
    %18 = vector.broadcast %17 : vector<1x32xf32> to vector<16x32xf32>
    %19 = arith.addf %16, %18 : vector<16x32xf32>
    %c0_12 = arith.constant 0 : index
    %c0_13 = arith.constant 0 : index
    %c0_14 = arith.constant 0 : index
    %20 = vector.load %arg6[%c0_12, %c0_13, %c0_14] : memref<3x64x32xf32, #tpu.memory_space<vmem>>, vector<1x64x32xf32>
    %21 = vector.shape_cast %20 : vector<1x64x32xf32> to vector<64x32xf32>
    %c1_15 = arith.constant 1 : index
    %c0_16 = arith.constant 0 : index
    %c0_17 = arith.constant 0 : index
    %22 = vector.load %arg6[%c1_15, %c0_16, %c0_17] : memref<3x64x32xf32, #tpu.memory_space<vmem>>, vector<1x64x32xf32>
    %23 = vector.shape_cast %22 : vector<1x64x32xf32> to vector<64x32xf32>
    %c2_18 = arith.constant 2 : index
    %c0_19 = arith.constant 0 : index
    %c0_20 = arith.constant 0 : index
    %24 = vector.load %arg6[%c2_18, %c0_19, %c0_20] : memref<3x64x32xf32, #tpu.memory_space<vmem>>, vector<1x64x32xf32>
    %25 = vector.shape_cast %24 : vector<1x64x32xf32> to vector<64x32xf32>
    %26 = vector.extract_strided_slice %25 {offsets = [0, 0], sizes = [64, 16], strides = [1, 1]} : vector<64x32xf32> to vector<64x16xf32>
    %27 = tpu.concatenate %7, %7, %7, %7 in 0 : vector<16x32xf32>, vector<16x32xf32>, vector<16x32xf32>, vector<16x32xf32> -> vector<64x32xf32>
    %28 = arith.mulf %27, %21 : vector<64x32xf32>
    "tpu.trace_start"() <{level = 10 : i32, message = "re,te->rt"}> : () -> ()
    %cst_21 = arith.constant dense<0.000000e+00> : vector<64x16xf32>
    %29 = tpu.matmul %28, %13, %cst_21 {dimension_numbers = #tpu.dot_dimension_numbers<[1], [1], [0], [0], [0, 0, 1, 0], [], []>} : vector<64x32xf32>, vector<16x32xf32>, vector<64x16xf32> -> vector<64x16xf32>
    "tpu.trace_stop"() : () -> ()
    %30 = arith.addf %29, %26 : vector<64x16xf32>
    %cst_22 = arith.constant dense<0xFF800000> : vector<64xf32>
    %31 = vector.multi_reduction <maximumf>, %30, %cst_22 [1] : vector<64x16xf32> to vector<64xf32>
    %32 = vector.shape_cast %31 : vector<64xf32> to vector<64x1xf32>
    %33 = vector.broadcast %32 : vector<64x1xf32> to vector<64x16xf32>
    %34 = arith.subf %30, %33 : vector<64x16xf32>
    %35 = math.exp %34 : vector<64x16xf32>
    %cst_23 = arith.constant dense<0.000000e+00> : vector<64xf32>
    %36 = vector.multi_reduction <add>, %35, %cst_23 [1] : vector<64x16xf32> to vector<64xf32>
    %37 = vector.shape_cast %36 : vector<64xf32> to vector<64x1xf32>
    %38 = vector.broadcast %37 : vector<64x1xf32> to vector<64x16xf32>
    %39 = arith.divf %35, %38 : vector<64x16xf32>
    %cst_24 = arith.constant dense<0.000000e+00> : vector<64x32xf32>
    %40 = tpu.matmul %39, %19, %cst_24 {dimension_numbers = #tpu.dot_dimension_numbers<[1], [0], [0], [1], [0, 0, 1, 1], [], []>} : vector<64x16xf32>, vector<16x32xf32>, vector<64x32xf32> -> vector<64x32xf32>
    %41 = arith.mulf %40, %23 : vector<64x32xf32>
    %42 = vector.extract_strided_slice %41 {offsets = [0, 0], sizes = [16, 32], strides = [1, 1]} : vector<64x32xf32> to vector<16x32xf32>
    %43 = vector.extract_strided_slice %41 {offsets = [16, 0], sizes = [16, 32], strides = [1, 1]} : vector<64x32xf32> to vector<16x32xf32>
    %44 = arith.addf %42, %43 : vector<16x32xf32>
    %45 = vector.extract_strided_slice %41 {offsets = [32, 0], sizes = [16, 32], strides = [1, 1]} : vector<64x32xf32> to vector<16x32xf32>
    %46 = arith.addf %44, %45 : vector<16x32xf32>
    %47 = vector.extract_strided_slice %41 {offsets = [48, 0], sizes = [16, 32], strides = [1, 1]} : vector<64x32xf32> to vector<16x32xf32>
    %48 = arith.addf %46, %47 : vector<16x32xf32>
    %c3 = arith.constant 3 : index
    %c0_25 = arith.constant 0 : index
    %c0_26 = arith.constant 0 : index
    %49 = vector.load %arg2[%c3, %c0_25, %c0_26] : memref<4x32x32xf32, #tpu.memory_space<vmem>>, vector<1x32x32xf32>
    %50 = vector.shape_cast %49 : vector<1x32x32xf32> to vector<32x32xf32>
    %cst_27 = arith.constant dense<0.000000e+00> : vector<16x32xf32>
    %51 = tpu.matmul %48, %50, %cst_27 {dimension_numbers = #tpu.dot_dimension_numbers<[1], [0], [0], [1], [0, 0, 1, 1], [], []>} : vector<16x32xf32>, vector<32x32xf32>, vector<16x32xf32> -> vector<16x32xf32>
    %52 = vector.extract_strided_slice %1 {offsets = [3, 0], sizes = [1, 32], strides = [1, 1]} : vector<16x128xf32> to vector<1x32xf32>
    %53 = vector.broadcast %52 : vector<1x32xf32> to vector<16x32xf32>
    %54 = arith.addf %51, %53 : vector<16x32xf32>
    %55 = arith.addf %54, %0 : vector<16x32xf32>
    %cst_28 = arith.constant dense<0.000000e+00> : vector<16xf32>
    %56 = vector.multi_reduction <add>, %55, %cst_28 [1] : vector<16x32xf32> to vector<16xf32>
    %57 = vector.shape_cast %56 : vector<16xf32> to vector<16x1xf32>
    %cst_29 = arith.constant 3.200000e+01 : f32
    %58 = vector.broadcast %cst_29 : f32 to vector<16x1xf32>
    %59 = arith.divf %57, %58 : vector<16x1xf32>
    %60 = vector.broadcast %59 : vector<16x1xf32> to vector<16x32xf32>
    %61 = arith.subf %55, %60 : vector<16x32xf32>
    %62 = arith.mulf %61, %61 : vector<16x32xf32>
    %cst_30 = arith.constant dense<0.000000e+00> : vector<16xf32>
    %63 = vector.multi_reduction <add>, %62, %cst_30 [1] : vector<16x32xf32> to vector<16xf32>
    %64 = vector.shape_cast %63 : vector<16xf32> to vector<16x1xf32>
    %cst_31 = arith.constant 3.200000e+01 : f32
    %65 = vector.broadcast %cst_31 : f32 to vector<16x1xf32>
    %66 = arith.divf %64, %65 : vector<16x1xf32>
    %67 = vector.broadcast %59 : vector<16x1xf32> to vector<16x32xf32>
    %68 = arith.subf %55, %67 : vector<16x32xf32>
    %cst_32 = arith.constant 9.99999974E-6 : f32
    %69 = vector.broadcast %cst_32 : f32 to vector<16x1xf32>
    %70 = arith.addf %66, %69 : vector<16x1xf32>
    %71 = math.rsqrt %70 : vector<16x1xf32>
    %72 = vector.broadcast %71 : vector<16x1xf32> to vector<16x32xf32>
    %73 = arith.mulf %68, %72 : vector<16x32xf32>
    %74 = vector.extract_strided_slice %1 {offsets = [4, 0], sizes = [1, 32], strides = [1, 1]} : vector<16x128xf32> to vector<1x32xf32>
    %75 = vector.broadcast %74 : vector<1x32xf32> to vector<16x32xf32>
    %76 = arith.mulf %73, %75 : vector<16x32xf32>
    %77 = vector.extract_strided_slice %1 {offsets = [5, 0], sizes = [1, 32], strides = [1, 1]} : vector<16x128xf32> to vector<1x32xf32>
    %78 = vector.broadcast %77 : vector<1x32xf32> to vector<16x32xf32>
    %79 = arith.addf %76, %78 : vector<16x32xf32>
    %c0_33 = arith.constant 0 : index
    %c0_34 = arith.constant 0 : index
    %80 = vector.load %arg3[%c0_33, %c0_34] : memref<32x128xf32, #tpu.memory_space<vmem>>, vector<32x128xf32>
    %cst_35 = arith.constant dense<0.000000e+00> : vector<16x128xf32>
    %81 = tpu.matmul %79, %80, %cst_35 {dimension_numbers = #tpu.dot_dimension_numbers<[1], [0], [0], [1], [0, 0, 1, 1], [], []>} : vector<16x32xf32>, vector<32x128xf32>, vector<16x128xf32> -> vector<16x128xf32>
    %82 = vector.extract_strided_slice %1 {offsets = [6, 0], sizes = [1, 128], strides = [1, 1]} : vector<16x128xf32> to vector<1x128xf32>
    %83 = vector.broadcast %82 : vector<1x128xf32> to vector<16x128xf32>
    %84 = arith.addf %81, %83 : vector<16x128xf32>
    %cst_36 = arith.constant 5.000000e-01 : f32
    %85 = vector.broadcast %cst_36 : f32 to vector<16x128xf32>
    %86 = arith.mulf %85, %84 : vector<16x128xf32>
    %cst_37 = arith.constant 0.707106769 : f32
    %87 = vector.broadcast %cst_37 : f32 to vector<16x128xf32>
    %88 = arith.mulf %84, %87 : vector<16x128xf32>
    %89 = math.erf %88 : vector<16x128xf32>
    %cst_38 = arith.constant 1.000000e+00 : f32
    %90 = vector.broadcast %cst_38 : f32 to vector<16x128xf32>
    %91 = arith.addf %90, %89 : vector<16x128xf32>
    %92 = arith.mulf %86, %91 : vector<16x128xf32>
    %c0_39 = arith.constant 0 : index
    %c0_40 = arith.constant 0 : index
    %93 = vector.load %arg4[%c0_39, %c0_40] : memref<128x32xf32, #tpu.memory_space<vmem>>, vector<128x32xf32>
    %cst_41 = arith.constant dense<0.000000e+00> : vector<16x32xf32>
    %94 = tpu.matmul %92, %93, %cst_41 {dimension_numbers = #tpu.dot_dimension_numbers<[1], [0], [0], [1], [0, 0, 1, 1], [], []>} : vector<16x128xf32>, vector<128x32xf32>, vector<16x32xf32> -> vector<16x32xf32>
    %95 = vector.extract_strided_slice %1 {offsets = [7, 0], sizes = [1, 32], strides = [1, 1]} : vector<16x128xf32> to vector<1x32xf32>
    %96 = vector.broadcast %95 : vector<1x32xf32> to vector<16x32xf32>
    %97 = arith.addf %94, %96 : vector<16x32xf32>
    %98 = arith.addf %97, %79 : vector<16x32xf32>
    %cst_42 = arith.constant dense<0.000000e+00> : vector<16xf32>
    %99 = vector.multi_reduction <add>, %98, %cst_42 [1] : vector<16x32xf32> to vector<16xf32>
    %100 = vector.shape_cast %99 : vector<16xf32> to vector<16x1xf32>
    %cst_43 = arith.constant 3.200000e+01 : f32
    %101 = vector.broadcast %cst_43 : f32 to vector<16x1xf32>
    %102 = arith.divf %100, %101 : vector<16x1xf32>
    %103 = vector.broadcast %102 : vector<16x1xf32> to vector<16x32xf32>
    %104 = arith.subf %98, %103 : vector<16x32xf32>
    %105 = arith.mulf %104, %104 : vector<16x32xf32>
    %cst_44 = arith.constant dense<0.000000e+00> : vector<16xf32>
    %106 = vector.multi_reduction <add>, %105, %cst_44 [1] : vector<16x32xf32> to vector<16xf32>
    %107 = vector.shape_cast %106 : vector<16xf32> to vector<16x1xf32>
    %cst_45 = arith.constant 3.200000e+01 : f32
    %108 = vector.broadcast %cst_45 : f32 to vector<16x1xf32>
    %109 = arith.divf %107, %108 : vector<16x1xf32>
    %110 = vector.broadcast %102 : vector<16x1xf32> to vector<16x32xf32>
    %111 = arith.subf %98, %110 : vector<16x32xf32>
    %cst_46 = arith.constant 9.99999974E-6 : f32
    %112 = vector.broadcast %cst_46 : f32 to vector<16x1xf32>
    %113 = arith.addf %109, %112 : vector<16x1xf32>
    %114 = math.rsqrt %113 : vector<16x1xf32>
    %115 = vector.broadcast %114 : vector<16x1xf32> to vector<16x32xf32>
    %116 = arith.mulf %111, %115 : vector<16x32xf32>
    %117 = vector.extract_strided_slice %1 {offsets = [8, 0], sizes = [1, 32], strides = [1, 1]} : vector<16x128xf32> to vector<1x32xf32>
    %118 = vector.broadcast %117 : vector<1x32xf32> to vector<16x32xf32>
    %119 = arith.mulf %116, %118 : vector<16x32xf32>
    %120 = vector.extract_strided_slice %1 {offsets = [9, 0], sizes = [1, 32], strides = [1, 1]} : vector<16x128xf32> to vector<1x32xf32>
    %121 = vector.broadcast %120 : vector<1x32xf32> to vector<16x32xf32>
    %122 = arith.addf %119, %121 : vector<16x32xf32>
    %c0_47 = arith.constant 0 : index
    %c0_48 = arith.constant 0 : index
    %123 = vector.load %arg7[%c0_47, %c0_48] : memref<16x32xf32, #tpu.memory_space<vmem>>, vector<16x32xf32>
    tpu.vector_store %arg7[%c0_47, %c0_48], %122 {strides = array<i32>} : memref<16x32xf32, #tpu.memory_space<vmem>>, vector<16x32xf32>,
    return
  }
  func.func @transform_0(%arg0: i32) -> (i32, i32) {
    %c0_i32 = arith.constant 0 : i32
    %c0_i32_0 = arith.constant 0 : i32
    %c0_i32_1 = arith.constant 0 : i32
    return %c0_i32, %c0_i32_0 : i32, i32
  }
  func.func @transform_1(%arg0: i32) -> (i32, i32, i32) {
    %c0_i32 = arith.constant 0 : i32
    %c0_i32_0 = arith.constant 0 : i32
    %c0_i32_1 = arith.constant 0 : i32
    %c0_i32_2 = arith.constant 0 : i32
    return %c0_i32, %c0_i32_0, %c0_i32_1 : i32, i32, i32
  }
  func.func @transform_2(%arg0: i32) -> (i32, i32) {
    %c0_i32 = arith.constant 0 : i32
    %c0_i32_0 = arith.constant 0 : i32
    %c0_i32_1 = arith.constant 0 : i32
    return %c0_i32, %c0_i32_0 : i32, i32
  }
  func.func @transform_3(%arg0: i32) -> (i32, i32) {
    %c0_i32 = arith.constant 0 : i32
    %c0_i32_0 = arith.constant 0 : i32
    %c0_i32_1 = arith.constant 0 : i32
    return %c0_i32, %c0_i32_0 : i32, i32
  }
  func.func @transform_4(%arg0: i32) -> (i32, i32) {
    %c0_i32 = arith.constant 0 : i32
    %c0_i32_0 = arith.constant 0 : i32
    %c0_i32_1 = arith.constant 0 : i32
    return %c0_i32, %c0_i32_0 : i32, i32
  }
  func.func @transform_5(%arg0: i32) -> (i32, i32, i32) {
    %c0_i32 = arith.constant 0 : i32
    %c0_i32_0 = arith.constant 0 : i32
    %c0_i32_1 = arith.constant 0 : i32
    %c0_i32_2 = arith.constant 0 : i32
    return %c0_i32, %c0_i32_0, %c0_i32_1 : i32, i32, i32
  }
  func.func @transform_6(%arg0: i32) -> (i32, i32) {
    %c0_i32 = arith.constant 0 : i32
    %c0_i32_0 = arith.constant 0 : i32
    %c0_i32_1 = arith.constant 0 : i32
    return %c0_i32, %c0_i32_0 : i32, i32
  }
}

</mosaic_0001>

<bundles_post_ra>
// kernel: tpu_custom_call.1
= control target key start
LH: loop header
LB: loop body
LE: loop exit
PB: predicated region body
PF: predicated region fallthrough
CT: control target
= control target key end

     0   :  { %s1345_s0 = inlined_call_operand.vmem [shape: f32[16,32], index: 0, kind: input, shape index: {}]   ;;  %s1346_s1 = inlined_call_operand.vmem [shape: f32[4,32,32], index: 1, kind: input, shape index: {}]   ;;  %s1347_s2 = inlined_call_operand.vmem [shape: f32[32,128], index: 2, kind: input, shape index: {}]   ;;  %s1348_s3 = inlined_call_operand.vmem [shape: f32[128,32], index: 3, kind: input, shape index: {}]   ;;  %s1349_s4 = inlined_call_operand.vmem [shape: f32[16,128], index: 4, kind: input, shape index: {}]   ;;  %s1350_s5 = inlined_call_operand.vmem [shape: f32[3,64,32], index: 5, kind: input, shape index: {}]   ;;  %s1351_s6 = inlined_call_operand.hbm [shape: f32[16,32], index: 6, kind: output, shape index: {}]  }
   0x1   :  { %v31_v0 = vld [vmem:[%s1346_s1 + $0x18] sm:$0xff]  ;;  %v30_v1 = vld [vmem:[%s1346_s1 + $0x10] sm:$0xff]  ;;  %v29_v3 = vld [vmem:[%s1346_s1 + $0x8] sm:$0xff] }
   0x2   :  { %52 = vmatpush.msra.mxu2 %v31_v0  ;;  %v831_v2 = vld [vmem:[%s1346_s1 + $0x38] sm:$0xff]  ;;  %v830_v4 = vld [vmem:[%s1346_s1 + $0x30] sm:$0xff] }
   0x3   :  { %81 = vmatpush.msra.mxu1 %v831_v2 }
   0x4   :  { %53 = vmatpush.msra.mxu2 %v30_v1 }
   0x5   :  { %11 = vsyncpa [#allocation3], 0  ;;  %v28_v5 = vld [vmem:[%s1346_s1] sm:$0xff]  ;;  %82 = vmatpush.msra.mxu1 %v830_v4  ;;  %vm33_vm0 = vcmask 261120   ;;  %v829_v7 = vld [vmem:[%s1346_s1 + $0x28] sm:$0xff]  ;;  %vm226_vm1 = vcmask 130048  }
   0x6   :  { %54 = vmatpush.msra.mxu2 %v29_v3  ;;  %v1025_v6 = vld [vmem:[%s1345_s0] sm:$0xff]  ;;  %v1040_v9 = vld [vmem:[%s1345_s0 + $0x8] sm:$0xff]  ;;  %v123_v25 = vld [vmem:[%s1350_s5 + $0x10] sm:$0xff]  ;;  %s967_s22 = smov 128   ;;  %s968_s23 = smov 8  }
   0x7   :  { %83 = vmatpush.msra.mxu1 %v829_v7  ;;  %v828_v8 = vld [vmem:[%s1346_s1 + $0x20] sm:$0xff]  ;;  %v122_v23 = vld [vmem:[%s1350_s5 + $0x8] sm:$0xff]  ;;  %v124_v27 = vld [vmem:[%s1350_s5 + $0x18] sm:$0xff] }
   0x8   :  { %55 = vmatpush.msra.mxu2 %v28_v5  ;;  %v1049_v12 = vld [vmem:[%s1349_s4] sm:$0xff]  ;;  %v126_v31 = vld [vmem:[%s1350_s5 + $0x28] sm:$0xff]  ;;  %v127_v33 = vld [vmem:[%s1350_s5 + $0x30] sm:$0xff] }
   0x9   :  { %826 = vmatmul.msk.f32.vlgmr.msra.gmra.mxu2 %vm33_vm0, %v1025_v6  ;;  %84 = vmatpush.msra.mxu1 %v828_v8  ;;  %v68_v13 = vperm.slane %v1049_v12, 1  ;;  %v32_v14 = vperm.slane %v1049_v12, 0  ;;  %v121_v20 = vld [vmem:[%s1350_s5] sm:$0xff]  ;;  %v128_v35 = vld [vmem:[%s1350_s5 + $0x38] sm:$0xff]  ;;  %v849_v41 = vld [vmem:[%s1350_s5 + $0x88] sm:$0xff] }
   0xa   :  { %884 = vmatpush.msrb.mxu2 %v831_v2  ;;  %832 = vmatmul.msk.f32.vlgmr.msra.gmra.mxu1 %vm33_vm0, %v1025_v6  ;;  %v125_v29 = vld [vmem:[%s1350_s5 + $0x20] sm:$0xff]  ;;  %v850_v45 = vld [vmem:[%s1350_s5 + $0x90] sm:$0xff]  ;;  %v851_v49 = vld [vmem:[%s1350_s5 + $0x98] sm:$0xff] }
   0xb   :  { %v848_v37 = vld [vmem:[%s1350_s5 + $0x80] sm:$0xff]  ;;  %v837_v53 = vld [vmem:[%s1346_s1 + $0x58] sm:$0xff]  ;;  %v836_v54 = vld [vmem:[%s1346_s1 + $0x50] sm:$0xff] }
   0xc   :  { %885 = vmatpush.msrb.mxu2 %v830_v4  ;;  %v852_v55 = vld [vmem:[%s1350_s5 + $0xa0] sm:$0xff]  ;;  %v835_v56 = vld [vmem:[%s1346_s1 + $0x48] sm:$0xff]  ;;  %v854_v1 = vld [vmem:[%s1350_s5 + $0xb0] sm:$0xff] }
   0xd   :  { %v834_v58 = vld [vmem:[%s1346_s1 + $0x40] sm:$0xff]  ;;  %v853_v61 = vld [vmem:[%s1350_s5 + $0xa8] sm:$0xff]  ;;  %v855_v5 = vld [vmem:[%s1350_s5 + $0xb8] sm:$0xff] }
   0xe   :  { %886 = vmatpush.msrb.mxu2 %v829_v7 }
  0x10   :  { %887 = vmatpush.msrb.mxu2 %v828_v8 }
  0x11   :  { %827 = vmatmul.msk.f32.gmra.mxu2 %vm33_vm0, %v1040_v9 }
  0x12   :  { %110 = vmatpush.msra.mxu2 %v837_v53  ;;  %v97_v53 = vperm.slane %v1049_v12, 2 }
  0x14   :  { %111 = vmatpush.msra.mxu2 %v836_v54 }
  0x16   :  { %112 = vmatpush.msra.mxu2 %v835_v56 }
  0x18   :  { %113 = vmatpush.msra.mxu2 %v834_v58 }
  0x19   :  { %833 = vmatmul.msk.f32.vlgmr.msrb.gmra.mxu2 %vm33_vm0, %v1040_v9 }
  0x21   :  { %838 = vmatmul.msk.f32.vlgmr.msra.gmra.mxu2 %vm33_vm0, %v1025_v6 }
  0x29   :  { %839 = vmatmul.msk.f32.gmra.mxu2 %vm33_vm0, %v1040_v9 }
  0x87   :  { %v86_v16 = vpop.f32.mrf.mxu1 }
  0x88   :  { %v87_v18 = vadd.f32 %v86_v16, %v68_v13 }
  0x8c   :  { %v57_v10 = vpop.f32.mrf.mxu2 }
  0x8d   :  { %v58_v19 = vadd.f32 %v57_v10, %v32_v14 }
  0x8f   :  { %v147_v21 = vmul.f32 %v121_v20, %v58_v19  ;;  %v149_v26 = vmul.f32 %v123_v25, %v58_v19  ;;  %v151_v30 = vmul.f32 %v125_v29, %v58_v19  ;;  %v153_v34 = vmul.f32 %v127_v33, %v58_v19 }
  0x94   :  { %v60_v11 = vpop.f32.mrf.mxu2 }
  0x95   :  { %v61_v22 = vadd.f32 %v60_v11, %v32_v14 }
  0x97   :  { %v148_v24 = vmul.f32 %v122_v23, %v61_v22  ;;  %v150_v28 = vmul.f32 %v124_v27, %v61_v22  ;;  %v152_v32 = vmul.f32 %v126_v31, %v61_v22  ;;  %v154_v36 = vmul.f32 %v128_v35, %v61_v22 }
  0x9c   :  { %v89_v15 = vpop.f32.mrf.mxu2 }
  0x9d   :  { %v90_v17 = vadd.f32 %v89_v15, %v68_v13 }
  0x9f   :  { %856 = vmatpush.xpose.msk.msra.mxu3 %vm33_vm0, %v90_v17 }
  0xa3   :  { %857 = vmatpush.xpose.msk.msra.mxu3 %vm33_vm0, %v87_v18 }
  0xa6   :  { %858 = vmatmul.msk.f32.vlgmr.msra.gmra.mxu3 %vm33_vm0, %v147_v21 }
  0xae   :  { %859 = vmatmul.msk.f32.gmra.mxu3 %vm33_vm0, %v148_v24 }
  0xb6   :  { %860 = vmatmul.msk.f32.gmra.mxu3 %vm33_vm0, %v149_v26 }
  0xbe   :  { %861 = vmatmul.msk.f32.gmra.mxu3 %vm33_vm0, %v150_v28 }
  0xc6   :  { %862 = vmatmul.msk.f32.gmra.mxu3 %vm33_vm0, %v151_v30 }
  0xce   :  { %863 = vmatmul.msk.f32.gmra.mxu3 %vm33_vm0, %v152_v32 }
  0xd6   :  { %864 = vmatmul.msk.f32.gmra.mxu3 %vm33_vm0, %v153_v34 }
  0xde   :  { %865 = vmatmul.msk.f32.gmra.mxu3 %vm33_vm0, %v154_v36 }
 0x129   :  { %v202_v38 = vpop.f32.mrf.mxu3 }
 0x12a   :  { %v203_v39 = vadd.f32 %v848_v37, %v202_v38 }
 0x12c   :  { %v227_v40 = vsel %vm226_vm1, %v203_v39, -inf }
 0x12d   :  { %228 = vmax.xlane.f32.xlu0 %v227_v40 }
 0x131   :  { %v205_v42 = vpop.f32.mrf.mxu3 }
 0x132   :  { %v206_v43 = vadd.f32 %v849_v41, %v205_v42 }
 0x134   :  { %v230_v44 = vsel %vm226_vm1, %v206_v43, -inf }
 0x135   :  { %231 = vmax.xlane.f32.xlu0 %v230_v44 }
 0x139   :  { %v208_v46 = vpop.f32.mrf.mxu3 }
 0x13a   :  { %v209_v47 = vadd.f32 %v850_v45, %v208_v46 }
 0x13c   :  { %v233_v48 = vsel %vm226_vm1, %v209_v47, -inf }
 0x13d   :  { %234 = vmax.xlane.f32.xlu1 %v233_v48 }
 0x141   :  { %v211_v50 = vpop.f32.mrf.mxu3 }
 0x142   :  { %v212_v51 = vadd.f32 %v851_v49, %v211_v50 }
 0x144   :  { %v236_v52 = vsel %vm226_vm1, %v212_v51, -inf }
 0x145   :  { %237 = vmax.xlane.f32.xlu1 %v236_v52  ;;  %v115_v52 = vpop.f32.mrf.mxu2 }
 0x149   :  { %v214_v57 = vpop.f32.mrf.mxu3 }
 0x14a   :  { %v215_v59 = vadd.f32 %v852_v55, %v214_v57  ;;  %v116_v55 = vadd.f32 %v115_v52, %v97_v53 }
 0x14c   :  { %v239_v60 = vsel %vm226_vm1, %v215_v59, -inf }
 0x14d   :  { %240 = vmax.xlane.f32.xlu2 %v239_v60  ;;  %v118_v54 = vpop.f32.mrf.mxu2 }
 0x14e   :  { %v119_v56 = vadd.f32 %v118_v54, %v97_v53 }
 0x150   :  { %457 = vmatpush.msra.mxu0 %v119_v56 }
 0x151   :  { %v217_v62 = vpop.f32.mrf.mxu3 }
 0x152   :  { %v218_v63 = vadd.f32 %v853_v61, %v217_v62  ;;  %458 = vmatpush.msra.mxu0 %v116_v55 }
 0x154   :  { %v242_v0 = vsel %vm226_vm1, %v218_v63, -inf }
 0x155   :  { %243 = vmax.xlane.f32.xlu2 %v242_v0 }
 0x159   :  { %v220_v2 = vpop.f32.mrf.mxu3 }
 0x15a   :  { %v221_v3 = vadd.f32 %v854_v1, %v220_v2 }
 0x15c   :  { %v245_v4 = vsel %vm226_vm1, %v221_v3, -inf }
 0x15d   :  { %246 = vmax.xlane.f32.xlu0 %v245_v4 }
 0x161   :  { %v223_v7 = vpop.f32.mrf.mxu3 }
 0x162   :  { %v224_v8 = vadd.f32 %v855_v5, %v223_v7 }
 0x164   :  { %v248_v10 = vsel %vm226_vm1, %v224_v8, -inf }
 0x165   :  { %249 = vmax.xlane.f32.xlu2 %v248_v10 }
 0x1a0   :  { %v229_v11 = vpop.xlane.xlu0 %228 }
 0x1a1   :  { %v251_v13 = vsub.f32 %v203_v39, %v229_v11 }
 0x1a3   :  { %v259_v14 = vmul.f32 1.442695, %v251_v13 }
 0x1a5   :  { %892 = vpow2.f32 %v259_v14 }
 0x1a8   :  { %v232_v15 = vpop.xlane.xlu0 %231 }
 0x1a9   :  { %v252_v16 = vsub.f32 %v206_v43, %v232_v15 }
 0x1ab   :  { %v1135_v17 = vpop.eup %892  ;;  %v261_v18 = vmul.f32 1.442695, %v252_v16 }
 0x1ac   :  { %v275_v19 = vsel %vm226_vm1, %v1135_v17, 0.0 }
 0x1ad   :  { %894 = vpow2.f32 %v261_v18  ;;  %276 = vadd.xlane.f32.xlu1 %v275_v19 }
 0x1b0   :  { %v235_v20 = vpop.xlane.xlu1 %234 }
 0x1b1   :  { %v253_v21 = vsub.f32 %v209_v47, %v235_v20 }
 0x1b3   :  { %v1139_v22 = vpop.eup %894  ;;  %v263_v23 = vmul.f32 1.442695, %v253_v21 }
 0x1b4   :  { %v278_v24 = vsel %vm226_vm1, %v1139_v22, 0.0 }
 0x1b5   :  { %896 = vpow2.f32 %v263_v23  ;;  %279 = vadd.xlane.f32.xlu0 %v278_v24 }
 0x1b8   :  { %v238_v25 = vpop.xlane.xlu1 %237 }
 0x1b9   :  { %v254_v26 = vsub.f32 %v212_v51, %v238_v25 }
 0x1bb   :  { %v1143_v27 = vpop.eup %896  ;;  %v265_v28 = vmul.f32 1.442695, %v254_v26 }
 0x1bc   :  { %v281_v29 = vsel %vm226_vm1, %v1143_v27, 0.0 }
 0x1bd   :  { %898 = vpow2.f32 %v265_v28  ;;  %282 = vadd.xlane.f32.xlu1 %v281_v29 }
 0x1c0   :  { %v241_v30 = vpop.xlane.xlu2 %240 }
 0x1c1   :  { %v255_v31 = vsub.f32 %v215_v59, %v241_v30 }
 0x1c3   :  { %v1147_v32 = vpop.eup %898  ;;  %v267_v33 = vmul.f32 1.442695, %v255_v31 }
 0x1c4   :  { %v284_v34 = vsel %vm226_vm1, %v1147_v32, 0.0 }
 0x1c5   :  { %900 = vpow2.f32 %v267_v33  ;;  %285 = vadd.xlane.f32.xlu2 %v284_v34 }
 0x1c8   :  { %v244_v35 = vpop.xlane.xlu2 %243 }
 0x1c9   :  { %v256_v36 = vsub.f32 %v218_v63, %v244_v35 }
 0x1cb   :  { %v1151_v37 = vpop.eup %900  ;;  %v269_v38 = vmul.f32 1.442695, %v256_v36 }
 0x1cc   :  { %v287_v39 = vsel %vm226_vm1, %v1151_v37, 0.0 }
 0x1cd   :  { %902 = vpow2.f32 %v269_v38  ;;  %288 = vadd.xlane.f32.xlu0 %v287_v39 }
 0x1d0   :  { %v247_v40 = vpop.xlane.xlu0 %246 }
 0x1d1   :  { %v257_v41 = vsub.f32 %v221_v3, %v247_v40 }
 0x1d3   :  { %v1155_v42 = vpop.eup %902  ;;  %v271_v43 = vmul.f32 1.442695, %v257_v41 }
 0x1d4   :  { %v290_v44 = vsel %vm226_vm1, %v1155_v42, 0.0 }
 0x1d5   :  { %904 = vpow2.f32 %v271_v43  ;;  %291 = vadd.xlane.f32.xlu1 %v290_v44 }
 0x1d8   :  { %v250_v45 = vpop.xlane.xlu2 %249 }
 0x1d9   :  { %v258_v46 = vsub.f32 %v224_v8, %v250_v45 }
 0x1db   :  { %v1159_v47 = vpop.eup %904  ;;  %v273_v48 = vmul.f32 1.442695, %v258_v46 }
 0x1dc   :  { %v293_v49 = vsel %vm226_vm1, %v1159_v47, 0.0 }
 0x1dd   :  { %906 = vpow2.f32 %v273_v48  ;;  %294 = vadd.xlane.f32.xlu2 %v293_v49 }
 0x1e3   :  { %v1163_v50 = vpop.eup %906 }
 0x1e4   :  { %v296_v51 = vsel %vm226_vm1, %v1163_v50, 0.0 }
 0x1e5   :  { %297 = vadd.xlane.f32.xlu0 %v296_v51 }
 0x220   :  { %v277_v57 = vpop.xlane.xlu1 %276 }
 0x221   :  { %908 = vrcp.f32 %v277_v57  ;;  %v310_v62 = vand.u32 2147483648, %v277_v57  ;;  %v308_v0 = vand.u32 2147483647, %v277_v57  ;;  %vm304_vm3 = vweird.f32 %v277_v57 }
 0x223   :  { %v311_v3 = vor.u32 1.1754944e-38, %v310_v62  ;;  %vm309_vm5 = vcmp.eq.f32.partialorder %v308_v0, 8.507059e+37 }
 0x227   :  { %v909_v58 = vpop.eup %908 }
 0x228   :  { %v300_v59 = vmul.f32 %v909_v58, %v277_v57  ;;  %v280_v60 = vpop.xlane.xlu0 %279  ;;  %vm305_vm2 = vweird.f32 %v909_v58 }
 0x229   :  { %910 = vrcp.f32 %v280_v60  ;;  %vm306_vm4 = vmor %vm304_vm3, %vm305_vm2  ;;  %v325_v13 = vand.u32 2147483648, %v280_v60  ;;  %v323_v15 = vand.u32 2147483647, %v280_v60  ;;  %vm319_vm7 = vweird.f32 %v280_v60 }
 0x22a   :  { %v301_v61 = vsub.f32 1.0, %v300_v59 }
 0x22b   :  { %v326_v19 = vor.u32 1.1754944e-38, %v325_v13  ;;  %vm324_vm9 = vcmp.eq.f32.partialorder %v323_v15, 8.507059e+37 }
 0x22c   :  { %v302_v63 = vmul.f32 %v909_v58, %v301_v61 }
 0x22e   :  { %v303_v1 = vadd.f32 %v909_v58, %v302_v63 }
 0x22f   :  { %v911_v2 = vpop.eup %910 }
 0x230   :  { %v315_v4 = vmul.f32 %v911_v2, %v280_v60  ;;  %v283_v5 = vpop.xlane.xlu1 %282  ;;  %v307_v7 = vsel %vm306_vm4, %v909_v58, %v303_v1  ;;  %vm320_vm6 = vweird.f32 %v911_v2 }
 0x231   :  { %912 = vrcp.f32 %v283_v5  ;;  %v312_v8 = vsel %vm309_vm5, %v311_v3, %v307_v7  ;;  %vm321_vm8 = vmor %vm319_vm7, %vm320_vm6  ;;  %v340_v26 = vand.u32 2147483648, %v283_v5  ;;  %v338_v29 = vand.u32 2147483647, %v283_v5 }
 0x232   :  { %v316_v10 = vsub.f32 1.0, %v315_v4  ;;  %v313_v11 = vmul.f32 %v1135_v17, %v312_v8  ;;  %vm334_vm11 = vweird.f32 %v283_v5 }
 0x233   :  { %v341_v33 = vor.u32 1.1754944e-38, %v340_v26  ;;  %vm339_vm13 = vcmp.eq.f32.partialorder %v338_v29, 8.507059e+37 }
 0x234   :  { %v317_v14 = vmul.f32 %v911_v2, %v316_v10  ;;  %866 = vmatmul.msk.f32.vlgmr.msra.gmra.mxu0 %vm226_vm1, %v313_v11 }
 0x236   :  { %v318_v16 = vadd.f32 %v911_v2, %v317_v14 }
 0x237   :  { %v913_v18 = vpop.eup %912 }
 0x238   :  { %v330_v20 = vmul.f32 %v913_v18, %v283_v5  ;;  %v286_v21 = vpop.xlane.xlu2 %285  ;;  %v322_v23 = vsel %vm321_vm8, %v911_v2, %v318_v16  ;;  %vm335_vm10 = vweird.f32 %v913_v18 }
 0x239   :  { %914 = vrcp.f32 %v286_v21  ;;  %v327_v24 = vsel %vm324_vm9, %v326_v19, %v322_v23  ;;  %vm336_vm12 = vmor %vm334_vm11, %vm335_vm10  ;;  %v355_v40 = vand.u32 2147483648, %v286_v21  ;;  %v353_v43 = vand.u32 2147483647, %v286_v21 }
 0x23a   :  { %v331_v25 = vsub.f32 1.0, %v330_v20  ;;  %v328_v17 = vmul.f32 %v1139_v22, %v327_v24  ;;  %vm349_vm15 = vweird.f32 %v286_v21 }
 0x23b   :  { %v356_v46 = vor.u32 1.1754944e-38, %v355_v40  ;;  %vm354_vm3 = vcmp.eq.f32.partialorder %v353_v43, 8.507059e+37  ;;  %v875_v40 = vld [vmem:[%s1346_s1 + $0x68] sm:$0xff] }
 0x23c   :  { %v332_v28 = vmul.f32 %v913_v18, %v331_v25  ;;  %867 = vmatmul.msk.f32.gmra.mxu0 %vm226_vm1, %v328_v17 }
 0x23e   :  { %v333_v30 = vadd.f32 %v913_v18, %v332_v28 }
 0x23f   :  { %v915_v31 = vpop.eup %914 }
 0x240   :  { %v345_v34 = vmul.f32 %v915_v31, %v286_v21  ;;  %v289_v35 = vpop.xlane.xlu0 %288  ;;  %v337_v36 = vsel %vm336_vm12, %v913_v18, %v333_v30  ;;  %vm350_vm14 = vweird.f32 %v915_v31 }
 0x241   :  { %916 = vrcp.f32 %v289_v35  ;;  %v342_v38 = vsel %vm339_vm13, %v341_v33, %v337_v36  ;;  %vm351_vm2 = vmor %vm349_vm15, %vm350_vm14  ;;  %v370_v54 = vand.u32 2147483648, %v289_v35  ;;  %v368_v56 = vand.u32 2147483647, %v289_v35 }
 0x242   :  { %v346_v39 = vsub.f32 1.0, %v345_v34  ;;  %v343_v22 = vmul.f32 %v1143_v27, %v342_v38  ;;  %vm364_vm5 = vweird.f32 %v289_v35 }
 0x243   :  { %v371_v59 = vor.u32 1.1754944e-38, %v370_v54  ;;  %vm369_vm7 = vcmp.eq.f32.partialorder %v368_v56, 8.507059e+37  ;;  %v843_v54 = vld [vmem:[%s1350_s5 + $0x58] sm:$0xff] }
 0x244   :  { %v347_v41 = vmul.f32 %v915_v31, %v346_v39  ;;  %868 = vmatmul.msk.f32.gmra.mxu0 %vm226_vm1, %v343_v22  ;;  %v876_v39 = vld [vmem:[%s1346_s1 + $0x70] sm:$0xff] }
 0x246   :  { %v348_v44 = vadd.f32 %v915_v31, %v347_v41 }
 0x247   :  { %v917_v45 = vpop.eup %916 }
 0x248   :  { %v360_v48 = vmul.f32 %v917_v45, %v289_v35  ;;  %v292_v49 = vpop.xlane.xlu1 %291  ;;  %v352_v51 = vsel %vm351_vm2, %v915_v31, %v348_v44  ;;  %vm365_vm4 = vweird.f32 %v917_v45  ;;  %v842_v44 = vld [vmem:[%s1350_s5 + $0x50] sm:$0xff] }
 0x249   :  { %918 = vrcp.f32 %v292_v49  ;;  %v357_v52 = vsel %vm354_vm3, %v356_v46, %v352_v51  ;;  %vm366_vm6 = vmor %vm364_vm5, %vm365_vm4  ;;  %v385_v1 = vand.u32 2147483648, %v292_v49  ;;  %v383_v3 = vand.u32 2147483647, %v292_v49  ;;  %v840_v46 = vld [vmem:[%s1350_s5 + $0x40] sm:$0xff] }
 0x24a   :  { %v361_v53 = vsub.f32 1.0, %v360_v48  ;;  %v358_v27 = vmul.f32 %v1147_v32, %v357_v52  ;;  %vm379_vm9 = vweird.f32 %v292_v49  ;;  %v844_v48 = vld [vmem:[%s1350_s5 + $0x60] sm:$0xff] }
 0x24b   :  { %v386_v7 = vor.u32 1.1754944e-38, %v385_v1  ;;  %vm384_vm11 = vcmp.eq.f32.partialorder %v383_v3, 8.507059e+37 }
 0x24c   :  { %v362_v55 = vmul.f32 %v917_v45, %v361_v53  ;;  %869 = vmatmul.msk.f32.gmra.mxu0 %vm226_vm1, %v358_v27  ;;  %v846_v53 = vld [vmem:[%s1350_s5 + $0x70] sm:$0xff] }
 0x24e   :  { %v363_v57 = vadd.f32 %v917_v45, %v362_v55 }
 0x24f   :  { %v919_v58 = vpop.eup %918 }
 0x250   :  { %v375_v60 = vmul.f32 %v919_v58, %v292_v49  ;;  %v295_v61 = vpop.xlane.xlu2 %294  ;;  %v367_v62 = vsel %vm366_vm6, %v917_v45, %v363_v57  ;;  %vm380_vm8 = vweird.f32 %v919_v58 }
 0x251   :  { %920 = vrcp.f32 %v295_v61  ;;  %v372_v63 = vsel %vm369_vm7, %v371_v59, %v367_v62  ;;  %vm381_vm10 = vmor %vm379_vm9, %vm380_vm8  ;;  %v400_v15 = vand.u32 2147483648, %v295_v61  ;;  %v398_v18 = vand.u32 2147483647, %v295_v61  ;;  %v845_v59 = vld [vmem:[%s1350_s5 + $0x68] sm:$0xff] }
 0x252   :  { %v376_v0 = vsub.f32 1.0, %v375_v60  ;;  %v373_v32 = vmul.f32 %v1151_v37, %v372_v63  ;;  %vm394_vm13 = vweird.f32 %v295_v61 }
 0x253   :  { %v401_v21 = vor.u32 1.1754944e-38, %v400_v15  ;;  %vm399_vm15 = vcmp.eq.f32.partialorder %v398_v18, 8.507059e+37 }
 0x254   :  { %v377_v2 = vmul.f32 %v919_v58, %v376_v0  ;;  %870 = vmatmul.msk.f32.gmra.mxu0 %vm226_vm1, %v373_v32  ;;  %v847_v0 = vld [vmem:[%s1350_s5 + $0x78] sm:$0xff] }
 0x256   :  { %v378_v4 = vadd.f32 %v919_v58, %v377_v2 }
 0x257   :  { %v921_v5 = vpop.eup %920 }
 0x258   :  { %v390_v8 = vmul.f32 %v921_v5, %v295_v61  ;;  %v298_v10 = vpop.xlane.xlu0 %297  ;;  %v382_v11 = vsel %vm381_vm10, %v919_v58, %v378_v4  ;;  %vm395_vm12 = vweird.f32 %v921_v5  ;;  %v841_v58 = vld [vmem:[%s1350_s5 + $0x48] sm:$0xff] }
 0x259   :  { %922 = vrcp.f32 %v298_v10  ;;  %v387_v13 = vsel %vm384_vm11, %v386_v7, %v382_v11  ;;  %vm396_vm14 = vmor %vm394_vm13, %vm395_vm12  ;;  %v415_v28 = vand.u32 2147483648, %v298_v10  ;;  %v413_v29 = vand.u32 2147483647, %v298_v10 }
 0x25a   :  { %v391_v14 = vsub.f32 1.0, %v390_v8  ;;  %v388_v37 = vmul.f32 %v1155_v42, %v387_v13  ;;  %vm409_vm3 = vweird.f32 %v298_v10 }
 0x25b   :  { %v416_v31 = vor.u32 1.1754944e-38, %v415_v28  ;;  %vm414_vm5 = vcmp.eq.f32.partialorder %v413_v29, 8.507059e+37 }
 0x25c   :  { %v392_v16 = vmul.f32 %v921_v5, %v391_v14  ;;  %871 = vmatmul.msk.f32.gmra.mxu0 %vm226_vm1, %v388_v37 }
 0x25e   :  { %v393_v19 = vadd.f32 %v921_v5, %v392_v16  ;;  %v965_v16 = vmov 32.0  }
 0x25f   :  { %v923_v20 = vpop.eup %922  ;;  %924 = vrcp.f32 %v965_v16 }
 0x260   :  { %v405_v23 = vmul.f32 %v923_v20, %v298_v10  ;;  %v397_v24 = vsel %vm396_vm14, %v921_v5, %v393_v19  ;;  %vm410_vm2 = vweird.f32 %v923_v20  ;;  %v503_v5 = vperm.slane %v1049_v12, 3 }
 0x261   :  { %v402_v25 = vsel %vm399_vm15, %v401_v21, %v397_v24  ;;  %vm411_vm4 = vmor %vm409_vm3, %vm410_vm2 }
 0x262   :  { %v406_v17 = vsub.f32 1.0, %v405_v23  ;;  %v403_v26 = vmul.f32 %v1159_v47, %v402_v25  ;;  %v877_v47 = vld [vmem:[%s1346_s1 + $0x78] sm:$0xff] }
 0x263   :  { %522 = vmatpush.msrb.mxu1 %v877_v47 }
 0x264   :  { %v407_v42 = vmul.f32 %v923_v20, %v406_v17  ;;  %872 = vmatmul.msk.f32.gmra.mxu0 %vm226_vm1, %v403_v26 }
 0x265   :  { %523 = vmatpush.msrb.mxu1 %v876_v39  ;;  %v925_v18 = vpop.eup %924 }
 0x266   :  { %v408_v30 = vadd.f32 %v923_v20, %v407_v42  ;;  %v542_v19 = vmul.f32 32.0, %v925_v18 }
 0x267   :  { %524 = vmatpush.msrb.mxu1 %v875_v40 }
 0x268   :  { %v412_v33 = vsel %vm411_vm4, %v923_v20, %v408_v30  ;;  %v543_v20 = vsub.f32 1.0, %v542_v19 }
 0x269   :  { %v417_v34 = vsel %vm414_vm5, %v416_v31, %v412_v33  ;;  %v595_v33 = vld [vmem:[%s1347_s2 + $0x18] sm:$0xff] }
 0x26a   :  { %v418_v35 = vmul.f32 %v1163_v50, %v417_v34  ;;  %v874_v50 = vld [vmem:[%s1346_s1 + $0x60] sm:$0xff]  ;;  %v544_v21 = vmul.f32 %v925_v18, %v543_v20  ;;  %615 = vmatpush.msrb.mxu2 %v595_v33  ;;  %v594_v34 = vld [vmem:[%s1347_s2 + $0x10] sm:$0xff]  ;;  %s814_s1 = sshll.u32 %s1351_s6, 4  ;;  %s815_s1 = int_to_ptr.hbm [resolvable:$true] %s814_s1 }
 0x26b   :  { %525 = vmatpush.msrb.mxu1 %v874_v50 }
 0x26c   :  { %873 = vmatmul.msk.f32.gmra.mxu0 %vm226_vm1, %v418_v35  ;;  %v545_v23 = vadd.f32 %v925_v18, %v544_v21  ;;  %vm546_vm1 = vweird.f32 %v925_v18  ;;  %616 = vmatpush.msrb.mxu2 %v594_v34  ;;  %v593_v35 = vld [vmem:[%s1347_s2 + $0x8] sm:$0xff]  ;;  %v720_v21 = vld [vmem:[%s1348_s3 + $0x30] sm:$0xff] }
 0x26e   :  { %v1227_v24 = vsel %vm546_vm1, %v925_v18, %v545_v23  ;;  %617 = vmatpush.msrb.mxu2 %v593_v35  ;;  %v716_v35 = vld [vmem:[%s1348_s3 + $0x10] sm:$0xff] }
 0x2b1   :  { %v460_v36 = vpop.f32.mrf.mxu0 }
 0x2b2   :  { %v484_v51 = vmul.f32 %v840_v46, %v460_v36  ;;  %v592_v36 = vld [vmem:[%s1347_s2] sm:$0xff] }
 0x2b3   :  { %618 = vmatpush.msrb.mxu2 %v592_v36 }
 0x2b9   :  { %v463_v38 = vpop.f32.mrf.mxu0 }
 0x2ba   :  { %v485_v62 = vmul.f32 %v841_v58, %v463_v38 }
 0x2c1   :  { %v466_v22 = vpop.f32.mrf.mxu0 }
 0x2c2   :  { %v486_v49 = vmul.f32 %v842_v44, %v466_v22 }
 0x2c4   :  { %v492_v27 = vadd.f32 %v486_v49, %v484_v51 }
 0x2c9   :  { %v469_v41 = vpop.f32.mrf.mxu0 }
 0x2ca   :  { %v487_v60 = vmul.f32 %v843_v54, %v469_v41 }
 0x2cc   :  { %v493_v32 = vadd.f32 %v487_v60, %v485_v62 }
 0x2d1   :  { %v472_v43 = vpop.f32.mrf.mxu0 }
 0x2d2   :  { %v488_v52 = vmul.f32 %v844_v48, %v472_v43 }
 0x2d4   :  { %v494_v56 = vadd.f32 %v492_v27, %v488_v52  ;;  %v586_v52 = vperm.slane %v1049_v12, 4 }
 0x2d9   :  { %v475_v45 = vpop.f32.mrf.mxu0 }
 0x2da   :  { %v489_v63 = vmul.f32 %v845_v59, %v475_v45 }
 0x2dc   :  { %v495_v2 = vadd.f32 %v493_v32, %v489_v63  ;;  %v729_v32 = vld [vmem:[%s1348_s3 + $0x78] sm:$0xff] }
 0x2dd   :  { %731 = vmatpush.msra.mxu1 %v729_v32 }
 0x2e1   :  { %v478_v55 = vpop.f32.mrf.mxu0 }
 0x2e2   :  { %v490_v57 = vmul.f32 %v846_v53, %v478_v55  ;;  %v589_v55 = vperm.slane %v1049_v12, 5 }
 0x2e4   :  { %v496_v61 = vadd.f32 %v494_v56, %v490_v57 }
 0x2e6   :  { %878 = vmatmul.msk.f32.vlgmr.msrb.gmra.mxu1 %vm33_vm0, %v496_v61 }
 0x2e9   :  { %v481_v1 = vpop.f32.mrf.mxu0 }
 0x2ea   :  { %v491_v3 = vmul.f32 %v847_v0, %v481_v1  ;;  %v728_v1 = vld [vmem:[%s1348_s3 + $0x70] sm:$0xff] }
 0x2eb   :  { %732 = vmatpush.msra.mxu1 %v728_v1 }
 0x2ec   :  { %v497_v4 = vadd.f32 %v495_v2, %v491_v3  ;;  %v727_v2 = vld [vmem:[%s1348_s3 + $0x68] sm:$0xff]  ;;  %v596_v3 = vperm.slane %v1049_v12, 6 }
 0x2ed   :  { %733 = vmatpush.msra.mxu1 %v727_v2 }
 0x2ee   :  { %879 = vmatmul.msk.f32.gmra.mxu1 %vm33_vm0, %v497_v4  ;;  %v726_v4 = vld [vmem:[%s1348_s3 + $0x60] sm:$0xff] }
 0x2ef   :  { %734 = vmatpush.msra.mxu1 %v726_v4 }
 0x363   :  { %v527_v7 = vpop.f32.mrf.mxu1 }
 0x364   :  { %v528_v8 = vadd.f32 %v527_v7, %v503_v5 }
 0x366   :  { %v533_v10 = vadd.f32 %v528_v8, %v1025_v6 }
 0x368   :  { %v535_v11 = vsel %vm33_vm0, %v533_v10, 0.0 }
 0x369   :  { %536 = vadd.xlane.f32.xlu1 %v535_v11  ;;  %v723_v11 = vld [vmem:[%s1348_s3 + $0x48] sm:$0xff] }
 0x36b   :  { %v530_v13 = vpop.f32.mrf.mxu1 }
 0x36c   :  { %v531_v14 = vadd.f32 %v530_v13, %v503_v5  ;;  %v725_v5 = vld [vmem:[%s1348_s3 + $0x58] sm:$0xff] }
 0x36d   :  { %735 = vmatpush.msra.mxu1 %v725_v5 }
 0x36e   :  { %v534_v37 = vadd.f32 %v531_v14, %v1040_v9  ;;  %v722_v14 = vld [vmem:[%s1348_s3 + $0x40] sm:$0xff] }
 0x370   :  { %v538_v15 = vsel %vm33_vm0, %v534_v37, 0.0 }
 0x371   :  { %539 = vadd.xlane.f32.xlu2 %v538_v15  ;;  %v721_v15 = vld [vmem:[%s1348_s3 + $0x38] sm:$0xff] }
 0x3dc   :  { %v537_v6 = vpop.xlane.xlu1 %536 }
 0x3dd   :  { %v548_v25 = vmul.f32 %v1227_v24, %v537_v6 }
 0x3df   :  { %v550_v17 = vsub.f32 %v533_v10, %v548_v25  ;;  %v724_v10 = vld [vmem:[%s1348_s3 + $0x50] sm:$0xff]  ;;  %v719_v25 = vld [vmem:[%s1348_s3 + $0x28] sm:$0xff] }
 0x3e0   :  { %736 = vmatpush.msra.mxu1 %v724_v10 }
 0x3e1   :  { %v552_v26 = vmul.f32 %v550_v17, %v550_v17 }
 0x3e2   :  { %737 = vmatpush.msra.mxu1 %v723_v11 }
 0x3e3   :  { %v554_v9 = vsel %vm33_vm0, %v552_v26, 0.0 }
 0x3e4   :  { %555 = vadd.xlane.f32.xlu0 %v554_v9  ;;  %v540_v28 = vpop.xlane.xlu2 %539  ;;  %738 = vmatpush.msra.mxu1 %v722_v14 }
 0x3e5   :  { %v549_v42 = vmul.f32 %v1227_v24, %v540_v28  ;;  %v718_v28 = vld [vmem:[%s1348_s3 + $0x20] sm:$0xff] }
 0x3e6   :  { %739 = vmatpush.msra.mxu1 %v721_v15 }
 0x3e7   :  { %v551_v29 = vsub.f32 %v534_v37, %v549_v42 }
 0x3e8   :  { %740 = vmatpush.msra.mxu1 %v720_v21 }
 0x3e9   :  { %v553_v30 = vmul.f32 %v551_v29, %v551_v29 }
 0x3ea   :  { %741 = vmatpush.msra.mxu1 %v719_v25 }
 0x3eb   :  { %v557_v31 = vsel %vm33_vm0, %v553_v30, 0.0  ;;  %v717_v30 = vld [vmem:[%s1348_s3 + $0x18] sm:$0xff] }
 0x3ec   :  { %558 = vadd.xlane.f32.xlu1 %v557_v31  ;;  %742 = vmatpush.msra.mxu1 %v718_v28 }
 0x3ee   :  { %743 = vmatpush.msra.mxu1 %v717_v30 }
 0x3f0   :  { %744 = vmatpush.msra.mxu1 %v716_v35 }
 0x457   :  { %v556_v38 = vpop.xlane.xlu0 %555 }
 0x458   :  { %v560_v47 = vmul.f32 %v556_v38, %v1227_v24 }
 0x45a   :  { %v562_v39 = vadd.f32 1e-05, %v560_v47 }
 0x45c   :  { %926 = vrsqrt.f32 %v562_v39  ;;  %vm570_vm7 = vweird.f32 %v562_v39 }
 0x45f   :  { %v559_v22 = vpop.xlane.xlu1 %558 }
 0x460   :  { %v561_v40 = vmul.f32 %v559_v22, %v1227_v24 }
 0x462   :  { %v927_v50 = vpop.eup %926  ;;  %v563_v41 = vadd.f32 1e-05, %v561_v40 }
 0x463   :  { %v565_v43 = vmul.f32 %v927_v50, %v562_v39  ;;  %vm571_vm6 = vweird.f32 %v927_v50  ;;  %v715_v39 = vld [vmem:[%s1348_s3 + $0x8] sm:$0xff] }
 0x464   :  { %928 = vrsqrt.f32 %v563_v41  ;;  %vm572_vm8 = vmor %vm570_vm7, %vm571_vm6  ;;  %vm580_vm10 = vweird.f32 %v563_v41  ;;  %745 = vmatpush.msra.mxu1 %v715_v39 }
 0x465   :  { %v566_v44 = vmul.f32 %v927_v50, %v565_v43 }
 0x467   :  { %v567_v45 = vmul.f32 0.5, %v566_v44 }
 0x469   :  { %v568_v46 = vsub.f32 1.5, %v567_v45 }
 0x46a   :  { %v929_v48 = vpop.eup %928 }
 0x46b   :  { %v569_v49 = vmul.f32 %v927_v50, %v568_v46  ;;  %v575_v51 = vmul.f32 %v929_v48, %v563_v41  ;;  %vm581_vm9 = vweird.f32 %v929_v48 }
 0x46c   :  { %vm582_vm11 = vmor %vm580_vm10, %vm581_vm9 }
 0x46d   :  { %v573_v53 = vsel %vm572_vm8, %v927_v50, %v569_v49  ;;  %v576_v27 = vmul.f32 %v929_v48, %v575_v51  ;;  %v714_v50 = vld [vmem:[%s1348_s3] sm:$0xff] }
 0x46e   :  { %v584_v54 = vmul.f32 %v573_v53, %v550_v17  ;;  %746 = vmatpush.msra.mxu1 %v714_v50 }
 0x46f   :  { %v577_v56 = vmul.f32 0.5, %v576_v27 }
 0x470   :  { %v587_v57 = vmul.f32 %v586_v52, %v584_v54 }
 0x471   :  { %v578_v58 = vsub.f32 1.5, %v577_v56 }
 0x472   :  { %v1249_v59 = vadd.f32 %v589_v55, %v587_v57 }
 0x473   :  { %v579_v60 = vmul.f32 %v929_v48, %v578_v58 }
 0x474   :  { %880 = vmatmul.msk.f32.vlgmr.msrb.gmra.mxu2 %vm33_vm0, %v1249_v59 }
 0x475   :  { %v583_v61 = vsel %vm582_vm11, %v929_v48, %v579_v60 }
 0x476   :  { %v585_v62 = vmul.f32 %v583_v61, %v551_v29 }
 0x478   :  { %v588_v63 = vmul.f32 %v586_v52, %v585_v62 }
 0x47a   :  { %v1253_v0 = vadd.f32 %v589_v55, %v588_v63 }
 0x47c   :  { %881 = vmatmul.msk.f32.gmra.mxu2 %vm33_vm0, %v1253_v0 }
 0x4f7   :  { %v620_v7 = vpop.f32.mrf.mxu2 }
 0x4f8   :  { %v1273_v8 = vadd.f32 %v620_v7, %v596_v3 }
 0x4fa   :  { %v1279_v12 = vmul.f32 0.70710677, %v1273_v8  ;;  %v626_v30 = vmul.f32 0.5, %v1273_v8  ;;  %v938_v8 = vld [vmem:[%s1349_s4] sm:$0xff] }
 0x4fc   :  { %v630_v13 = vmul.f32 %v1279_v12, %v1279_v12 }
 0x4fe   :  { %v631_v37 = vmin.f32 %v630_v13, 16.0 }
 0x4ff   :  { %v623_v16 = vpop.f32.mrf.mxu2 }
 0x500   :  { %v632_v18 = vmul.f32 2.1237322e-06, %v631_v37  ;;  %v643_v19 = vmul.f32 3.8918573e-05, %v631_v37  ;;  %v1292_v20 = vadd.f32 %v623_v16, %v596_v3 }
 0x502   :  { %v633_v23 = vadd.f32 0.00028619796, %v632_v18  ;;  %v644_v6 = vadd.f32 0.001143296, %v643_v19  ;;  %v1301_v17 = vmul.f32 0.70710677, %v1292_v20 }
 0x504   :  { %v634_v26 = vmul.f32 %v633_v23, %v631_v37  ;;  %v645_v9 = vmul.f32 %v644_v6, %v631_v37  ;;  %v670_v42 = vmul.f32 %v1301_v17, %v1301_v17 }
 0x506   :  { %v646_v29 = vadd.f32 0.014752088, %v645_v9  ;;  %v635_v31 = vadd.f32 0.0036580483, %v634_v26  ;;  %v671_v33 = vmin.f32 %v670_v42, 16.0 }
 0x508   :  { %v647_v34 = vmul.f32 %v646_v29, %v631_v37  ;;  %v672_v36 = vmul.f32 2.1237322e-06, %v671_v33  ;;  %v683_v38 = vmul.f32 3.8918573e-05, %v671_v33  ;;  %v636_v22 = vmul.f32 %v635_v31, %v631_v37 }
 0x50a   :  { %v648_v47 = vadd.f32 0.112945676, %v647_v34  ;;  %v673_v40 = vadd.f32 0.00028619796, %v672_v36  ;;  %v684_v41 = vadd.f32 0.001143296, %v683_v38 }
 0x50b   :  { %v637_v48 = vadd.f32 0.05243302, %v636_v22  ;;  %v627_v22 = vmul.f32 0.5, %v1292_v20 }
 0x50c   :  { %v649_v43 = vmul.f32 %v648_v47, %v631_v37  ;;  %v674_v44 = vmul.f32 %v673_v40, %v671_v33  ;;  %v685_v45 = vmul.f32 %v684_v41, %v671_v33  ;;  %v730_v41 = vperm.slane %v938_v8, 7 }
 0x50d   :  { %v638_v54 = vmul.f32 %v637_v48, %v631_v37 }
 0x50e   :  { %v650_v46 = vadd.f32 0.4994258, %v649_v43  ;;  %v686_v49 = vadd.f32 0.014752088, %v685_v45  ;;  %v675_v52 = vadd.f32 0.0036580483, %v674_v44 }
 0x50f   :  { %v639_v58 = vadd.f32 0.18741608, %v638_v54 }
 0x510   :  { %v651_v51 = vmul.f32 %v650_v46, %v631_v37  ;;  %v687_v53 = vmul.f32 %v686_v49, %v671_v33  ;;  %v676_v56 = vmul.f32 %v675_v52, %v671_v33 }
 0x511   :  { %v640_v32 = vmul.f32 %v639_v58, %v631_v37 }
 0x512   :  { %v652_v27 = vadd.f32 1.0, %v651_v51  ;;  %v688_v55 = vadd.f32 0.112945676, %v687_v53  ;;  %v677_v61 = vadd.f32 0.05243302, %v676_v56 }
 0x513   :  { %v641_v7 = vadd.f32 1.1283791, %v640_v32 }
 0x514   :  { %930 = vrcp.f32 %v652_v27  ;;  %v689_v57 = vmul.f32 %v688_v55, %v671_v33  ;;  %v678_v3 = vmul.f32 %v677_v61, %v671_v33  ;;  %v664_v5 = vand.u32 2147483648, %v652_v27 }
 0x515   :  { %v662_v11 = vand.u32 2147483647, %v652_v27  ;;  %vm658_vm13 = vweird.f32 %v652_v27  ;;  %v642_v18 = vmul.f32 %v641_v7, %v1279_v12 }
 0x516   :  { %v690_v60 = vadd.f32 0.4994258, %v689_v57  ;;  %v679_v13 = vadd.f32 0.18741608, %v678_v3  ;;  %v665_v15 = vor.u32 1.1754944e-38, %v664_v5  ;;  %v27_v5 = vld [vmem:[%s1349_s4 + $0x8] sm:$0xff] }
 0x517   :  { %vm663_vm15 = vcmp.eq.f32.partialorder %v662_v11, 8.507059e+37  ;;  %s966_s4 = smov [#allocation2]  }
 0x518   :  { %v691_v62 = vmul.f32 %v690_v60, %v671_v33  ;;  %v680_v21 = vmul.f32 %v679_v13, %v671_v33  ;;  %v800_v13 = vperm.slane %v27_v5, 0  ;;  %s812_s19 = sshll.u32 %s966_s4, 4  ;;  %s813_s19 = int_to_ptr.vmem [resolvable:$true] %s812_s19 }
 0x51a   :  { %v931_v63 = vpop.eup %930  ;;  %v692_v2 = vadd.f32 1.0, %v691_v62  ;;  %v681_v28 = vadd.f32 1.1283791, %v680_v21 }
 0x51b   :  { %v654_v1 = vmul.f32 %v931_v63, %v652_v27  ;;  %vm659_vm12 = vweird.f32 %v931_v63 }
 0x51c   :  { %932 = vrcp.f32 %v692_v2  ;;  %vm660_vm14 = vmor %vm658_vm13, %vm659_vm12  ;;  %v704_v9 = vand.u32 2147483648, %v692_v2  ;;  %v702_v29 = vand.u32 2147483647, %v692_v2  ;;  %vm698_vm3 = vweird.f32 %v692_v2 }
 0x51d   :  { %v655_v4 = vsub.f32 1.0, %v654_v1  ;;  %v682_v36 = vmul.f32 %v681_v28, %v1301_v17 }
 0x51e   :  { %v705_v12 = vor.u32 1.1754944e-38, %v704_v9  ;;  %vm703_vm5 = vcmp.eq.f32.partialorder %v702_v29, 8.507059e+37 }
 0x51f   :  { %v656_v10 = vmul.f32 %v931_v63, %v655_v4 }
 0x521   :  { %v657_v14 = vadd.f32 %v931_v63, %v656_v10 }
 0x522   :  { %v933_v16 = vpop.eup %932 }
 0x523   :  { %v661_v19 = vsel %vm660_vm14, %v931_v63, %v657_v14  ;;  %v694_v23 = vmul.f32 %v933_v16, %v692_v2  ;;  %vm699_vm2 = vweird.f32 %v933_v16 }
 0x524   :  { %v666_v37 = vsel %vm663_vm15, %v665_v15, %v661_v19  ;;  %vm700_vm4 = vmor %vm698_vm3, %vm699_vm2 }
 0x525   :  { %v667_v6 = vmul.f32 %v666_v37, %v642_v18  ;;  %v695_v25 = vsub.f32 1.0, %v694_v23  ;;  %v803_v18 = vperm.slane %v27_v5, 1 }
 0x527   :  { %v882_v26 = vclamps-f32 %v667_v6, 1.0  ;;  %v696_v42 = vmul.f32 %v933_v16, %v695_v25 }
 0x529   :  { %v710_v31 = vadd.f32 1.0, %v882_v26  ;;  %v697_v34 = vadd.f32 %v933_v16, %v696_v42 }
 0x52b   :  { %v712_v35 = vmul.f32 %v710_v31, %v626_v30  ;;  %v701_v33 = vsel %vm700_vm4, %v933_v16, %v697_v34 }
 0x52c   :  { %v706_v38 = vsel %vm703_vm5, %v705_v12, %v701_v33 }
 0x52d   :  { %747 = vmatmul.f32.vlgmr.msra.gmra.mxu1 %v712_v35  ;;  %v707_v47 = vmul.f32 %v706_v38, %v682_v36 }
 0x52f   :  { %v883_v39 = vclamps-f32 %v707_v47, 1.0 }
 0x531   :  { %v711_v40 = vadd.f32 1.0, %v883_v39 }
 0x533   :  { %v713_v50 = vmul.f32 %v711_v40, %v627_v22 }
 0x535   :  { %750 = vmatmul.f32.gmra.mxu1 %v713_v50 }
 0x5aa   :  { %v748_v43 = vpop.f32.mrf.mxu1 }
 0x5ab   :  { %v749_v44 = vadd.f32 %v748_v43, %v730_v41 }
 0x5ad   :  { %v754_v17 = vadd.f32 %v749_v44, %v1249_v59 }
 0x5af   :  { %v756_v45 = vsel %vm33_vm0, %v754_v17, 0.0 }
 0x5b0   :  { %757 = vadd.xlane.f32.xlu2 %v756_v45 }
 0x5b2   :  { %v751_v46 = vpop.f32.mrf.mxu1 }
 0x5b3   :  { %v752_v48 = vadd.f32 %v751_v46, %v730_v41 }
 0x5b5   :  { %v755_v49 = vadd.f32 %v752_v48, %v1253_v0 }
 0x5b7   :  { %v759_v20 = vsel %vm33_vm0, %v755_v49, 0.0 }
 0x5b8   :  { %760 = vadd.xlane.f32.xlu0 %v759_v20 }
 0x623   :  { %v758_v51 = vpop.xlane.xlu2 %757 }
 0x624   :  { %v762_v52 = vmul.f32 %v758_v51, %v1227_v24 }
 0x626   :  { %v764_v53 = vsub.f32 %v754_v17, %v762_v52 }
 0x628   :  { %v766_v27 = vmul.f32 %v764_v53, %v764_v53 }
 0x62a   :  { %v768_v54 = vsel %vm33_vm0, %v766_v27, 0.0 }
 0x62b   :  { %769 = vadd.xlane.f32.xlu1 %v768_v54  ;;  %v761_v55 = vpop.xlane.xlu0 %760 }
 0x62c   :  { %v763_v59 = vmul.f32 %v761_v55, %v1227_v24 }
 0x62e   :  { %v765_v56 = vsub.f32 %v755_v49, %v763_v59 }
 0x630   :  { %v767_v57 = vmul.f32 %v765_v56, %v765_v56 }
 0x632   :  { %v771_v58 = vsel %vm33_vm0, %v767_v57, 0.0 }
 0x633   :  { %772 = vadd.xlane.f32.xlu2 %v771_v58 }
 0x69e   :  { %v770_v0 = vpop.xlane.xlu1 %769 }
 0x69f   :  { %v774_v60 = vmul.f32 %v770_v0, %v1227_v24 }
 0x6a1   :  { %v776_v61 = vadd.f32 1e-05, %v774_v60 }
 0x6a3   :  { %934 = vrsqrt.f32 %v776_v61  ;;  %vm784_vm6 = vweird.f32 %v776_v61 }
 0x6a6   :  { %v773_v62 = vpop.xlane.xlu2 %772 }
 0x6a7   :  { %v775_v63 = vmul.f32 %v773_v62, %v1227_v24 }
 0x6a9   :  { %v935_v32 = vpop.eup %934  ;;  %v777_v2 = vadd.f32 1e-05, %v775_v63 }
 0x6aa   :  { %v779_v1 = vmul.f32 %v935_v32, %v776_v61  ;;  %vm785_vm1 = vweird.f32 %v935_v32 }
 0x6ab   :  { %936 = vrsqrt.f32 %v777_v2  ;;  %vm786_vm7 = vmor %vm784_vm6, %vm785_vm1  ;;  %vm794_vm9 = vweird.f32 %v777_v2 }
 0x6ac   :  { %v780_v3 = vmul.f32 %v935_v32, %v779_v1 }
 0x6ae   :  { %v781_v4 = vmul.f32 0.5, %v780_v3 }
 0x6b0   :  { %v782_v7 = vsub.f32 1.5, %v781_v4 }
 0x6b1   :  { %v937_v10 = vpop.eup %936 }
 0x6b2   :  { %v783_v11 = vmul.f32 %v935_v32, %v782_v7  ;;  %v789_v14 = vmul.f32 %v937_v10, %v777_v2  ;;  %vm795_vm8 = vweird.f32 %v937_v10 }
 0x6b3   :  { %vm796_vm10 = vmor %vm794_vm9, %vm795_vm8 }
 0x6b4   :  { %v787_v15 = vsel %vm786_vm7, %v935_v32, %v783_v11  ;;  %v790_v16 = vmul.f32 %v937_v10, %v789_v14 }
 0x6b5   :  { %v798_v24 = vmul.f32 %v787_v15, %v764_v53 }
 0x6b6   :  { %v791_v37 = vmul.f32 0.5, %v790_v16 }
 0x6b7   :  { %v801_v19 = vmul.f32 %v800_v13, %v798_v24 }
 0x6b8   :  { %v792_v21 = vsub.f32 1.5, %v791_v37 }
 0x6b9   :  { %v804_v23 = vadd.f32 %v803_v18, %v801_v19 }
 0x6ba   :  { %v793_v6 = vmul.f32 %v937_v10, %v792_v21 }
 0x6bb   :  { %806 = vst.msk [vmem:[#allocation2] sm:$0xff] %vm33_vm0, %v804_v23 }
 0x6bc   :  { %v797_v25 = vsel %vm796_vm10, %v937_v10, %v793_v6 }
 0x6bd   :  { %v799_v26 = vmul.f32 %v797_v25, %v765_v56 }
 0x6bf   :  { %v802_v9 = vmul.f32 %v800_v13, %v799_v26 }
 0x6c1   :  { %v805_v28 = vadd.f32 %v803_v18, %v802_v9 }
 0x6c3   :  { %807 = vst.msk [vmem:[#allocation2 + $0x8] sm:$0xff] %vm33_vm0, %v805_v28 }
 0x6c4   :  { %820 = dma.vmem_to_hbm [thread:$0]  %s813_s19, 256, %s815_s1, [#allocation3], %s967_s22, %s967_s22, %s968_s23  }
 0x6c5   :  { %963 = dma.done.wait [#allocation3], 256  }
 0x6c6   :  { %964 = vsyncadd [#allocation3], 4294967040 }
 0x6c7   :  { %825 = vsyncpa [#allocation3], 1 }

</bundles_post_ra>
